<compile_context>
chip_gen: v7x
topology: tpu7x:2x2x1
jax: 0.10.0
libtpu: 0.0.40
codegen_flags: <defaults>
</compile_context>

<pallas_src>
import functools

import numpy as np

import jax
import jax.numpy as jnp
from jax.experimental import pallas as pl
from jax.experimental.pallas import tpu as pltpu

EPS = 1e-5
_PAD = 128  # zero padding (flattened spatial positions) around y1 for conv2 windows


# ----------------------------------------------------------------------------
# Fused Pallas kernel: whole BasicBlock on one VMEM-resident tile
# ----------------------------------------------------------------------------
def _basic_block_kernel(a1_ref, w1_ref, b1_ref, w2_ref, b2_ref, wd_ref, bd_ref,
                        mask_ref, o_ref, ypad_ref, a2_ref, *, cin, wo):
    """Inputs (all 2-D, M = N*Ho*Wo on the lane axis):

      a1_ref:  [9*cin, M]      conv1 im2col patches
      w1_ref:  [planes, 9*cin] conv1 weights, BN1 scale pre-folded
      b1_ref:  [planes, 1]     BN1 bias (f32)
      w2_ref:  [planes, 9*planes] conv2 weights, BN2 scale pre-folded
      b2_ref:  [planes, 1]     BN2 bias (f32)
      wd_ref:  [planes, cin]   shortcut 1x1 weights (identity if no downsample)
      bd_ref:  [planes, 1]     shortcut bias (f32)
      mask_ref:[9, M]          0/1 validity mask per 3x3 tap (zero padding)
      o_ref:   [planes, M]     output (lane-dense: M is a multiple of 128)
      ypad_ref:[planes, M+2*_PAD] f32 scratch: zero-padded y1
      a2_ref:  [9*planes, M]   scratch: conv2 im2col patches built in VMEM
    """
    planes, m = o_ref.shape
    pad = _PAD

    a1 = a1_ref[...]                                   # [9*cin, M]

    # ---- shortcut: the 1x1/stride-s conv input is exactly the centre tap of
    #      the conv1 patches, so no separate strided-x input is needed. -------
    xs = a1_ref[4 * cin:5 * cin, :]                    # [cin, M]
    shortcut = jnp.dot(wd_ref[...], xs, preferred_element_type=jnp.float32)
    shortcut = shortcut + bd_ref[...]                  # [planes, M] f32

    # ---- conv1 + folded BN1 + ReLU (scale already in the weights) -----------
    y1 = jnp.dot(w1_ref[...], a1, preferred_element_type=jnp.float32)
    y1 = jnp.maximum(y1 + b1_ref[...], 0.0)            # [planes, M] f32

    # ---- build conv2 (3x3, stride 1, pad 1) patches from VMEM-resident y1 ---
    # Zero-pad y1 along the flattened (n, h, w) axis and read 9 shifted
    # windows; mask_ref zeroes taps that fall outside the image or wrap across
    # rows / batch images.
    ypad_ref[...] = jnp.zeros(ypad_ref.shape, jnp.float32)
    ypad_ref[:, pad:pad + m] = y1
    for t in range(9):
        dh, dw = t // 3 - 1, t % 3 - 1
        delta = dh * wo + dw
        start = pad + delta
        piece = ypad_ref[:, start:start + m] * mask_ref[t:t + 1, :]   # f32
        a2_ref[t * planes:(t + 1) * planes, :] = piece.astype(a2_ref.dtype)

    # ---- conv2 + folded BN2 + residual add + ReLU ----------------------------
    y2 = jnp.dot(w2_ref[...], a2_ref[...], preferred_element_type=jnp.float32)
    o_ref[...] = jnp.maximum(y2 + b2_ref[...] + shortcut, 0.0)


def _fused_block(a1_t, w1_t, b1, w2_t, b2, wd_t, bd, mask, *, cin, planes, wo,
                 compute_dtype):
    m = a1_t.shape[1]                    # N*Ho*Wo; multiple of 128 here -> lane-dense out
    args = (a1_t, w1_t, b1, w2_t, b2, wd_t, bd, mask)
    kernel = functools.partial(_basic_block_kernel, cin=cin, wo=wo)
    return pl.pallas_call(
        kernel,
        out_shape=jax.ShapeDtypeStruct((planes, m), jnp.float32),
        grid_spec=pltpu.PrefetchScalarGridSpec(
            num_scalar_prefetch=0,
            grid=(1,),  # everything fits comfortably in VMEM: a single step
            in_specs=[pl.BlockSpec(a.shape, lambda i: (0, 0)) for a in args],
            out_specs=pl.BlockSpec((planes, m), lambda i: (0, 0)),
            scratch_shapes=[
                pltpu.VMEM((planes, m + 2 * _PAD), jnp.float32),
                pltpu.VMEM((9 * planes, m), compute_dtype),
            ],
        ),
        compiler_params=pltpu.CompilerParams(
            dimension_semantics=("arbitrary",)),
    )(*args)


# ----------------------------------------------------------------------------
# Plain-JAX glue: im2col for the external input, BN folding, tap masks
# ----------------------------------------------------------------------------
def extract_patches_3x3(x, stride):
    """x: [N, H, W, C] -> ([N*Ho*Wo, 9*C], (N, Ho, Wo)).  pad=1, 3x3 kernel."""
    N, H, W, C = x.shape
    xp = jnp.pad(x, ((0, 0), (1, 1), (1, 1), (0, 0)))
    Ho = (H + 2 - 3) // stride + 1
    Wo = (W + 2 - 3) // stride + 1
    cols = []
    for dh in range(3):
        for dw in range(3):
            cols.append(
                xp[:, dh:dh + stride * (Ho - 1) + 1:stride,
                       dw:dw + stride * (Wo - 1) + 1:stride, :])
    a = jnp.concatenate(cols, axis=-1)              # [N, Ho, Wo, 9*C], (kh,kw,c)
    return a.reshape(N * Ho * Wo, 9 * C), (N, Ho, Wo)


def fold_bn(gamma, beta, mean, var, conv_bias=None):
    scale = gamma / jnp.sqrt(var + EPS)
    bias = beta - mean * scale
    if conv_bias is not None:
        bias = bias + conv_bias * scale
    return scale, bias


def _tap_masks(n, ho, wo):
    """[9, N*Ho*Wo] 0/1 mask: tap (kh,kw) valid for flattened position m."""
    m = n * ho * wo
    idx = np.arange(m)
    h = (idx // wo) % ho
    w = idx % wo
    masks = np.zeros((9, m), np.float32)
    for t in range(9):
        dh, dw = t // 3 - 1, t % 3 - 1
        masks[t] = ((h + dh >= 0) & (h + dh < ho)
                    & (w + dw >= 0) & (w + dw < wo))
    return masks


# ----------------------------------------------------------------------------
# BasicBlock forward (NHWC)
# ----------------------------------------------------------------------------
def basic_block_forward(x, p, stride, *, compute_dtype=jnp.float32):
    # compute_dtype defaults to f32: mixed bf16->f32 dots are rejected by the
    # interpret/CPU execution path ("DotThunk"); f32 also runs on the MXU.
    N, H, W, cin = x.shape
    planes = p["w1"].shape[-1]
    if p["wd"] is None:
        # The nn.Module only skips the downsample when stride==1 and in==out.
        assert stride == 1 and cin == planes, (stride, cin, planes)

    # conv1 im2col on the external input (conv2 patches are built in-kernel).
    a1, (N, Ho, Wo) = extract_patches_3x3(x, stride)          # [M, 9*cin]
    a1_t = a1.T.astype(compute_dtype)                          # [9*cin, M]

    # Fold BN scale into the conv weights -> kernel epilogues are only "+bias".
    s1, b1 = fold_bn(p["g1"], p["beta1"], p["m1"], p["v1"])
    w1_t = (p["w1"].reshape(9 * cin, planes) * s1).T.astype(compute_dtype)
    s2, b2 = fold_bn(p["g2"], p["beta2"], p["m2"], p["v2"])
    w2_t = (p["w2"].reshape(9 * planes, planes) * s2).T.astype(compute_dtype)

    if p["wd"] is not None:
        sd, bd = fold_bn(p["gd"], p["betad"], p["md"], p["vd"], p["bd_conv"])
        wd_t = (p["wd"].reshape(cin, planes) * sd).T.astype(compute_dtype)
    else:
        wd_t = jnp.eye(planes, dtype=compute_dtype)            # identity shortcut
        bd = jnp.zeros((planes,), jnp.float32)

    mask = jnp.asarray(_tap_masks(N, Ho, Wo))                  # [9, M]

    out_t = _fused_block(
        a1_t,
        w1_t, b1.reshape(planes, 1).astype(jnp.float32),
        w2_t, b2.reshape(planes, 1).astype(jnp.float32),
        wd_t, bd.reshape(planes, 1).astype(jnp.float32),
        mask,
        cin=cin, planes=planes, wo=Wo, compute_dtype=compute_dtype)

    return out_t.T.reshape(N, Ho, Wo, planes)


# ----------------------------------------------------------------------------
# Pure-JAX reference (faithful f32 module semantics)
# ----------------------------------------------------------------------------
def reference_block(x, p, stride):
    def conv(x, w, s, padding):
        return jax.lax.conv_general_dilated(
            x, w, window_strides=(s, s), padding=padding,
            dimension_numbers=("NHWC", "HWIO", "NHWC"),
            precision=jax.lax.Precision.HIGHEST)

    def bn(y, g, b, m, v):
        return (y - m) / jnp.sqrt(v + EPS) * g + b

    if p["wd"] is not None:
        sc = conv(x, p["wd"], stride, "VALID") + p["bd_conv"]
        sc = bn(sc, p["gd"], p["betad"], p["md"], p["vd"])
    else:
        sc = x
    y = conv(x, p["w1"], stride, [(1, 1), (1, 1)])
    y = jnp.maximum(bn(y, p["g1"], p["beta1"], p["m1"], p["v1"]), 0.0)
    y = conv(y, p["w2"], 1, [(1, 1), (1, 1)])
    y = bn(y, p["g2"], p["beta2"], p["m2"], p["v2"]) + sc
    return jnp.maximum(y, 0.0)


# ----------------------------------------------------------------------------
def make_params(key, inplanes, planes, stride):
    ks = jax.random.split(key, 16)
    p = {
        "w1": 0.1 * jax.random.normal(ks[0], (3, 3, inplanes, planes), jnp.float32),
        "g1": 1.0 + 0.1 * jax.random.normal(ks[1], (planes,), jnp.float32),
        "beta1": 0.1 * jax.random.normal(ks[2], (planes,), jnp.float32),
        "m1": 0.1 * jax.random.normal(ks[3], (planes,), jnp.float32),
        "v1": jax.random.uniform(ks[4], (planes,), jnp.float32, 0.5, 1.5),
        "w2": 0.1 * jax.random.normal(ks[5], (3, 3, planes, planes), jnp.float32),
        "g2": 1.0 + 0.1 * jax.random.normal(ks[6], (planes,), jnp.float32),
        "beta2": 0.1 * jax.random.normal(ks[7], (planes,), jnp.float32),
        "m2": 0.1 * jax.random.normal(ks[8], (planes,), jnp.float32),
        "v2": jax.random.uniform(ks[9], (planes,), jnp.float32, 0.5, 1.5),
        "wd": None, "bd_conv": None, "gd": None, "betad": None, "md": None, "vd": None,
    }
    if stride == 2 or inplanes != planes:
        p["wd"] = 0.1 * jax.random.normal(ks[10], (1, 1, inplanes, planes), jnp.float32)
        p["bd_conv"] = 0.1 * jax.random.normal(ks[11], (planes,), jnp.float32)
        p["gd"] = 1.0 + 0.1 * jax.random.normal(ks[12], (planes,), jnp.float32)
        p["betad"] = 0.1 * jax.random.normal(ks[13], (planes,), jnp.float32)
        p["md"] = 0.1 * jax.random.normal(ks[14], (planes,), jnp.float32)
        p["vd"] = jax.random.uniform(ks[15], (planes,), jnp.float32, 0.5, 1.5)
    return p


if __name__ == "__main__":
    key = jax.random.PRNGKey(0)
    k1, k2, k3, k4 = jax.random.split(key, 4)

    fwd = jax.jit(basic_block_forward, static_argnums=(2,))

    # f32 matmuls on the MXU (multi-pass) vs. a Precision.HIGHEST reference.
    RTOL = ATOL = 2e-2

    # Case 1: downsample path (stride 2, 8 -> 16 channels).
    # PyTorch NCHW input [2, 8, 16, 16] handled as NHWC [2, 16, 16, 8].
    x1 = jax.random.normal(k1, (2, 16, 16, 8), jnp.float32)
    p1 = make_params(k2, 8, 16, 2)
    out1 = jax.block_until_ready(fwd(x1, p1, 2))
    ref1 = jax.block_until_ready(reference_block(x1, p1, 2))
    assert out1.shape == ref1.shape, (out1.shape, ref1.shape)
    assert jnp.allclose(out1, ref1, rtol=RTOL, atol=ATOL), \
        float(jnp.max(jnp.abs(out1 - ref1)))

    # Case 2: identity-shortcut path (stride 1, inplanes == planes == 16).
    x2 = jax.random.normal(k3, (2, 16, 16, 16), jnp.float32)
    p2 = make_params(k4, 16, 16, 1)
    out2 = jax.block_until_ready(fwd(x2, p2, 1))
    ref2 = jax.block_until_ready(reference_block(x2, p2, 1))
    assert out2.shape == ref2.shape, (out2.shape, ref2.shape)
    assert jnp.allclose(out2, ref2, rtol=RTOL, atol=ATOL), \
        float(jnp.max(jnp.abs(out2 - ref2)))

    print("KERNEL_OK")
</pallas_src>

<mosaic_0001>
module attributes {stable_mosaic.version = 11 : i64} {
  func.func @_basic_block_kernel(%arg0: i32, %arg1: memref<72x128xf32, #tpu.memory_space<vmem>>, %arg2: memref<16x72xf32, #tpu.memory_space<vmem>>, %arg3: memref<16x1xf32, #tpu.memory_space<vmem>>, %arg4: memref<16x144xf32, #tpu.memory_space<vmem>>, %arg5: memref<16x1xf32, #tpu.memory_space<vmem>>, %arg6: memref<16x8xf32, #tpu.memory_space<vmem>>, %arg7: memref<16x1xf32, #tpu.memory_space<vmem>>, %arg8: memref<9x128xf32, #tpu.memory_space<vmem>>, %arg9: memref<16x128xf32, #tpu.memory_space<vmem>>, %arg10: memref<16x384xf32, #tpu.memory_space<vmem>>, %arg11: memref<144x128xf32, #tpu.memory_space<vmem>>) attributes {dimension_semantics = [#tpu.dimension_semantics<arbitrary>], iteration_bounds = array<i64: 1>, scalar_prefetch = 0 : i64, scratch_operands = 2 : i64, tpu.core_type = #tpu.core_type<tc>, window_params = [{pipeline_mode = #tpu.pipeline_mode<synchronous>, transform_indices = @transform_0, window_bounds = array<i64: 72, 128>}, {pipeline_mode = #tpu.pipeline_mode<synchronous>, transform_indices = @transform_1, window_bounds = array<i64: 16, 72>}, {pipeline_mode = #tpu.pipeline_mode<synchronous>, transform_indices = @transform_2, window_bounds = array<i64: 16, 1>}, {pipeline_mode = #tpu.pipeline_mode<synchronous>, transform_indices = @transform_3, window_bounds = array<i64: 16, 144>}, {pipeline_mode = #tpu.pipeline_mode<synchronous>, transform_indices = @transform_4, window_bounds = array<i64: 16, 1>}, {pipeline_mode = #tpu.pipeline_mode<synchronous>, transform_indices = @transform_5, window_bounds = array<i64: 16, 8>}, {pipeline_mode = #tpu.pipeline_mode<synchronous>, transform_indices = @transform_6, window_bounds = array<i64: 16, 1>}, {pipeline_mode = #tpu.pipeline_mode<synchronous>, transform_indices = @transform_7, window_bounds = array<i64: 9, 128>}, {pipeline_mode = #tpu.pipeline_mode<synchronous>, transform_indices = @transform_8, window_bounds = array<i64: 16, 128>}]} {
    %c0 = arith.constant 0 : index
    %c0_0 = arith.constant 0 : index
    %0 = vector.load %arg1[%c0, %c0_0] : memref<72x128xf32, #tpu.memory_space<vmem>>, vector<72x128xf32>
    %c32 = arith.constant 32 : index
    %c0_1 = arith.constant 0 : index
    %1 = vector.load %arg1[%c32, %c0_1] : memref<72x128xf32, #tpu.memory_space<vmem>>, vector<8x128xf32>
    %c0_2 = arith.constant 0 : index
    %c0_3 = arith.constant 0 : index
    %2 = vector.load %arg6[%c0_2, %c0_3] : memref<16x8xf32, #tpu.memory_space<vmem>>, vector<16x8xf32>
    %cst = arith.constant dense<0.000000e+00> : vector<16x128xf32>
    %3 = tpu.matmul %2, %1, %cst {dimension_numbers = #tpu.dot_dimension_numbers<[1], [0], [0], [1], [0, 0, 1, 1], [], []>} : vector<16x8xf32>, vector<8x128xf32>, vector<16x128xf32> -> vector<16x128xf32>
    %c0_4 = arith.constant 0 : index
    %c0_5 = arith.constant 0 : index
    %4 = vector.load %arg7[%c0_4, %c0_5] : memref<16x1xf32, #tpu.memory_space<vmem>>, vector<16x1xf32>
    %5 = vector.broadcast %4 : vector<16x1xf32> to vector<16x128xf32>
    %6 = arith.addf %3, %5 : vector<16x128xf32>
    %c0_6 = arith.constant 0 : index
    %c0_7 = arith.constant 0 : index
    %7 = vector.load %arg2[%c0_6, %c0_7] : memref<16x72xf32, #tpu.memory_space<vmem>>, vector<16x72xf32>
    %cst_8 = arith.constant dense<0.000000e+00> : vector<16x128xf32>
    %8 = tpu.matmul %7, %0, %cst_8 {dimension_numbers = #tpu.dot_dimension_numbers<[1], [0], [0], [1], [0, 0, 1, 1], [], []>} : vector<16x72xf32>, vector<72x128xf32>, vector<16x128xf32> -> vector<16x128xf32>
    %c0_9 = arith.constant 0 : index
    %c0_10 = arith.constant 0 : index
    %9 = vector.load %arg3[%c0_9, %c0_10] : memref<16x1xf32, #tpu.memory_space<vmem>>, vector<16x1xf32>
    %10 = vector.broadcast %9 : vector<16x1xf32> to vector<16x128xf32>
    %11 = arith.addf %8, %10 : vector<16x128xf32>
    %cst_11 = arith.constant 0.000000e+00 : f32
    %12 = vector.broadcast %cst_11 : f32 to vector<16x128xf32>
    %13 = arith.maximumf %11, %12 : vector<16x128xf32>
    %cst_12 = arith.constant 0.000000e+00 : f32
    %14 = vector.broadcast %cst_12 : f32 to vector<16x384xf32>
    %c0_13 = arith.constant 0 : index
    %c0_14 = arith.constant 0 : index
    %15 = vector.load %arg10[%c0_13, %c0_14] : memref<16x384xf32, #tpu.memory_space<vmem>>, vector<16x384xf32>
    tpu.vector_store %arg10[%c0_13, %c0_14], %14 {strides = array<i32>} : memref<16x384xf32, #tpu.memory_space<vmem>>, vector<16x384xf32>,
    %c0_15 = arith.constant 0 : index
    %c128 = arith.constant 128 : index
    %16 = vector.load %arg10[%c0_15, %c128] : memref<16x384xf32, #tpu.memory_space<vmem>>, vector<16x128xf32>
    tpu.vector_store %arg10[%c0_15, %c128], %13 {strides = array<i32>} : memref<16x384xf32, #tpu.memory_space<vmem>>, vector<16x128xf32>,
    %c0_16 = arith.constant 0 : index
    %c119 = arith.constant 119 : index
    %17 = vector.load %arg10[%c0_16, %c119] : memref<16x384xf32, #tpu.memory_space<vmem>>, vector<16x128xf32>
    %c0_17 = arith.constant 0 : index
    %c0_18 = arith.constant 0 : index
    %18 = vector.load %arg8[%c0_17, %c0_18] : memref<9x128xf32, #tpu.memory_space<vmem>>, vector<1x128xf32>
    %19 = vector.broadcast %18 : vector<1x128xf32> to vector<16x128xf32>
    %20 = arith.mulf %17, %19 : vector<16x128xf32>
    %c0_19 = arith.constant 0 : index
    %c0_20 = arith.constant 0 : index
    %21 = vector.load %arg11[%c0_19, %c0_20] : memref<144x128xf32, #tpu.memory_space<vmem>>, vector<16x128xf32>
    tpu.vector_store %arg11[%c0_19, %c0_20], %20 {strides = array<i32>} : memref<144x128xf32, #tpu.memory_space<vmem>>, vector<16x128xf32>,
    %c0_21 = arith.constant 0 : index
    %c120 = arith.constant 120 : index
    %22 = vector.load %arg10[%c0_21, %c120] : memref<16x384xf32, #tpu.memory_space<vmem>>, vector<16x128xf32>
    %c1 = arith.constant 1 : index
    %c0_22 = arith.constant 0 : index
    %23 = vector.load %arg8[%c1, %c0_22] : memref<9x128xf32, #tpu.memory_space<vmem>>, vector<1x128xf32>
    %24 = vector.broadcast %23 : vector<1x128xf32> to vector<16x128xf32>
    %25 = arith.mulf %22, %24 : vector<16x128xf32>
    %c16 = arith.constant 16 : index
    %c0_23 = arith.constant 0 : index
    %26 = vector.load %arg11[%c16, %c0_23] : memref<144x128xf32, #tpu.memory_space<vmem>>, vector<16x128xf32>
    tpu.vector_store %arg11[%c16, %c0_23], %25 {strides = array<i32>} : memref<144x128xf32, #tpu.memory_space<vmem>>, vector<16x128xf32>,
    %c0_24 = arith.constant 0 : index
    %c121 = arith.constant 121 : index
    %27 = vector.load %arg10[%c0_24, %c121] : memref<16x384xf32, #tpu.memory_space<vmem>>, vector<16x128xf32>
    %c2 = arith.constant 2 : index
    %c0_25 = arith.constant 0 : index
    %28 = vector.load %arg8[%c2, %c0_25] : memref<9x128xf32, #tpu.memory_space<vmem>>, vector<1x128xf32>
    %29 = vector.broadcast %28 : vector<1x128xf32> to vector<16x128xf32>
    %30 = arith.mulf %27, %29 : vector<16x128xf32>
    %c32_26 = arith.constant 32 : index
    %c0_27 = arith.constant 0 : index
    %31 = vector.load %arg11[%c32_26, %c0_27] : memref<144x128xf32, #tpu.memory_space<vmem>>, vector<16x128xf32>
    tpu.vector_store %arg11[%c32_26, %c0_27], %30 {strides = array<i32>} : memref<144x128xf32, #tpu.memory_space<vmem>>, vector<16x128xf32>,
    %c0_28 = arith.constant 0 : index
    %c127 = arith.constant 127 : index
    %32 = vector.load %arg10[%c0_28, %c127] : memref<16x384xf32, #tpu.memory_space<vmem>>, vector<16x128xf32>
    %c3 = arith.constant 3 : index
    %c0_29 = arith.constant 0 : index
    %33 = vector.load %arg8[%c3, %c0_29] : memref<9x128xf32, #tpu.memory_space<vmem>>, vector<1x128xf32>
    %34 = vector.broadcast %33 : vector<1x128xf32> to vector<16x128xf32>
    %35 = arith.mulf %32, %34 : vector<16x128xf32>
    %c48 = arith.constant 48 : index
    %c0_30 = arith.constant 0 : index
    %36 = vector.load %arg11[%c48, %c0_30] : memref<144x128xf32, #tpu.memory_space<vmem>>, vector<16x128xf32>
    tpu.vector_store %arg11[%c48, %c0_30], %35 {strides = array<i32>} : memref<144x128xf32, #tpu.memory_space<vmem>>, vector<16x128xf32>,
    %c0_31 = arith.constant 0 : index
    %c128_32 = arith.constant 128 : index
    %37 = vector.load %arg10[%c0_31, %c128_32] : memref<16x384xf32, #tpu.memory_space<vmem>>, vector<16x128xf32>
    %c4 = arith.constant 4 : index
    %c0_33 = arith.constant 0 : index
    %38 = vector.load %arg8[%c4, %c0_33] : memref<9x128xf32, #tpu.memory_space<vmem>>, vector<1x128xf32>
    %39 = vector.broadcast %38 : vector<1x128xf32> to vector<16x128xf32>
    %40 = arith.mulf %37, %39 : vector<16x128xf32>
    %c64 = arith.constant 64 : index
    %c0_34 = arith.constant 0 : index
    %41 = vector.load %arg11[%c64, %c0_34] : memref<144x128xf32, #tpu.memory_space<vmem>>, vector<16x128xf32>
    tpu.vector_store %arg11[%c64, %c0_34], %40 {strides = array<i32>} : memref<144x128xf32, #tpu.memory_space<vmem>>, vector<16x128xf32>,
    %c0_35 = arith.constant 0 : index
    %c129 = arith.constant 129 : index
    %42 = vector.load %arg10[%c0_35, %c129] : memref<16x384xf32, #tpu.memory_space<vmem>>, vector<16x128xf32>
    %c5 = arith.constant 5 : index
    %c0_36 = arith.constant 0 : index
    %43 = vector.load %arg8[%c5, %c0_36] : memref<9x128xf32, #tpu.memory_space<vmem>>, vector<1x128xf32>
    %44 = vector.broadcast %43 : vector<1x128xf32> to vector<16x128xf32>
    %45 = arith.mulf %42, %44 : vector<16x128xf32>
    %c80 = arith.constant 80 : index
    %c0_37 = arith.constant 0 : index
    %46 = vector.load %arg11[%c80, %c0_37] : memref<144x128xf32, #tpu.memory_space<vmem>>, vector<16x128xf32>
    tpu.vector_store %arg11[%c80, %c0_37], %45 {strides = array<i32>} : memref<144x128xf32, #tpu.memory_space<vmem>>, vector<16x128xf32>,
    %c0_38 = arith.constant 0 : index
    %c135 = arith.constant 135 : index
    %47 = vector.load %arg10[%c0_38, %c135] : memref<16x384xf32, #tpu.memory_space<vmem>>, vector<16x128xf32>
    %c6 = arith.constant 6 : index
    %c0_39 = arith.constant 0 : index
    %48 = vector.load %arg8[%c6, %c0_39] : memref<9x128xf32, #tpu.memory_space<vmem>>, vector<1x128xf32>
    %49 = vector.broadcast %48 : vector<1x128xf32> to vector<16x128xf32>
    %50 = arith.mulf %47, %49 : vector<16x128xf32>
    %c96 = arith.constant 96 : index
    %c0_40 = arith.constant 0 : index
    %51 = vector.load %arg11[%c96, %c0_40] : memref<144x128xf32, #tpu.memory_space<vmem>>, vector<16x128xf32>
    tpu.vector_store %arg11[%c96, %c0_40], %50 {strides = array<i32>} : memref<144x128xf32, #tpu.memory_space<vmem>>, vector<16x128xf32>,
    %c0_41 = arith.constant 0 : index
    %c136 = arith.constant 136 : index
    %52 = vector.load %arg10[%c0_41, %c136] : memref<16x384xf32, #tpu.memory_space<vmem>>, vector<16x128xf32>
    %c7 = arith.constant 7 : index
    %c0_42 = arith.constant 0 : index
    %53 = vector.load %arg8[%c7, %c0_42] : memref<9x128xf32, #tpu.memory_space<vmem>>, vector<1x128xf32>
    %54 = vector.broadcast %53 : vector<1x128xf32> to vector<16x128xf32>
    %55 = arith.mulf %52, %54 : vector<16x128xf32>
    %c112 = arith.constant 112 : index
    %c0_43 = arith.constant 0 : index
    %56 = vector.load %arg11[%c112, %c0_43] : memref<144x128xf32, #tpu.memory_space<vmem>>, vector<16x128xf32>
    tpu.vector_store %arg11[%c112, %c0_43], %55 {strides = array<i32>} : memref<144x128xf32, #tpu.memory_space<vmem>>, vector<16x128xf32>,
    %c0_44 = arith.constant 0 : index
    %c137 = arith.constant 137 : index
    %57 = vector.load %arg10[%c0_44, %c137] : memref<16x384xf32, #tpu.memory_space<vmem>>, vector<16x128xf32>
    %c8 = arith.constant 8 : index
    %c0_45 = arith.constant 0 : index
    %58 = vector.load %arg8[%c8, %c0_45] : memref<9x128xf32, #tpu.memory_space<vmem>>, vector<1x128xf32>
    %59 = vector.broadcast %58 : vector<1x128xf32> to vector<16x128xf32>
    %60 = arith.mulf %57, %59 : vector<16x128xf32>
    %c128_46 = arith.constant 128 : index
    %c0_47 = arith.constant 0 : index
    %61 = vector.load %arg11[%c128_46, %c0_47] : memref<144x128xf32, #tpu.memory_space<vmem>>, vector<16x128xf32>
    tpu.vector_store %arg11[%c128_46, %c0_47], %60 {strides = array<i32>} : memref<144x128xf32, #tpu.memory_space<vmem>>, vector<16x128xf32>,
    %c0_48 = arith.constant 0 : index
    %c0_49 = arith.constant 0 : index
    %62 = vector.load %arg4[%c0_48, %c0_49] : memref<16x144xf32, #tpu.memory_space<vmem>>, vector<16x144xf32>
    %c0_50 = arith.constant 0 : index
    %c0_51 = arith.constant 0 : index
    %63 = vector.load %arg11[%c0_50, %c0_51] : memref<144x128xf32, #tpu.memory_space<vmem>>, vector<144x128xf32>
    %cst_52 = arith.constant dense<0.000000e+00> : vector<16x128xf32>
    %64 = tpu.matmul %62, %63, %cst_52 {dimension_numbers = #tpu.dot_dimension_numbers<[1], [0], [0], [1], [0, 0, 1, 1], [], []>} : vector<16x144xf32>, vector<144x128xf32>, vector<16x128xf32> -> vector<16x128xf32>
    %c0_53 = arith.constant 0 : index
    %c0_54 = arith.constant 0 : index
    %65 = vector.load %arg5[%c0_53, %c0_54] : memref<16x1xf32, #tpu.memory_space<vmem>>, vector<16x1xf32>
    %66 = vector.broadcast %65 : vector<16x1xf32> to vector<16x128xf32>
    %67 = arith.addf %64, %66 : vector<16x128xf32>
    %68 = arith.addf %67, %6 : vector<16x128xf32>
    %cst_55 = arith.constant 0.000000e+00 : f32
    %69 = vector.broadcast %cst_55 : f32 to vector<16x128xf32>
    %70 = arith.maximumf %68, %69 : vector<16x128xf32>
    %c0_56 = arith.constant 0 : index
    %c0_57 = arith.constant 0 : index
    %71 = vector.load %arg9[%c0_56, %c0_57] : memref<16x128xf32, #tpu.memory_space<vmem>>, vector<16x128xf32>
    tpu.vector_store %arg9[%c0_56, %c0_57], %70 {strides = array<i32>} : memref<16x128xf32, #tpu.memory_space<vmem>>, vector<16x128xf32>,
    return
  }
  func.func @transform_0(%arg0: i32) -> (i32, i32) {
    %c0_i32 = arith.constant 0 : i32
    %c0_i32_0 = arith.constant 0 : i32
    %c0_i32_1 = arith.constant 0 : i32
    return %c0_i32, %c0_i32_0 : i32, i32
  }
  func.func @transform_1(%arg0: i32) -> (i32, i32) {
    %c0_i32 = arith.constant 0 : i32
    %c0_i32_0 = arith.constant 0 : i32
    %c0_i32_1 = arith.constant 0 : i32
    return %c0_i32, %c0_i32_0 : i32, i32
  }
  func.func @transform_2(%arg0: i32) -> (i32, i32) {
    %c0_i32 = arith.constant 0 : i32
    %c0_i32_0 = arith.constant 0 : i32
    %c0_i32_1 = arith.constant 0 : i32
    return %c0_i32, %c0_i32_0 : i32, i32
  }
  func.func @transform_3(%arg0: i32) -> (i32, i32) {
    %c0_i32 = arith.constant 0 : i32
    %c0_i32_0 = arith.constant 0 : i32
    %c0_i32_1 = arith.constant 0 : i32
    return %c0_i32, %c0_i32_0 : i32, i32
  }
  func.func @transform_4(%arg0: i32) -> (i32, i32) {
    %c0_i32 = arith.constant 0 : i32
    %c0_i32_0 = arith.constant 0 : i32
    %c0_i32_1 = arith.constant 0 : i32
    return %c0_i32, %c0_i32_0 : i32, i32
  }
  func.func @transform_5(%arg0: i32) -> (i32, i32) {
    %c0_i32 = arith.constant 0 : i32
    %c0_i32_0 = arith.constant 0 : i32
    %c0_i32_1 = arith.constant 0 : i32
    return %c0_i32, %c0_i32_0 : i32, i32
  }
  func.func @transform_6(%arg0: i32) -> (i32, i32) {
    %c0_i32 = arith.constant 0 : i32
    %c0_i32_0 = arith.constant 0 : i32
    %c0_i32_1 = arith.constant 0 : i32
    return %c0_i32, %c0_i32_0 : i32, i32
  }
  func.func @transform_7(%arg0: i32) -> (i32, i32) {
    %c0_i32 = arith.constant 0 : i32
    %c0_i32_0 = arith.constant 0 : i32
    %c0_i32_1 = arith.constant 0 : i32
    return %c0_i32, %c0_i32_0 : i32, i32
  }
  func.func @transform_8(%arg0: i32) -> (i32, i32) {
    %c0_i32 = arith.constant 0 : i32
    %c0_i32_0 = arith.constant 0 : i32
    %c0_i32_1 = arith.constant 0 : i32
    return %c0_i32, %c0_i32_0 : i32, i32
  }
}

</mosaic_0001>

<bundles_post_ra>
// kernel: basic_block_forward.1
= control target key start
LH: loop header
LB: loop body
LE: loop exit
PB: predicated region body
PF: predicated region fallthrough
CT: control target
= control target key end

     0   :  { %vm53_vm0 = vcmask 64512   ;;  %v855_v3 = vmov 0   ;;  %vm149_vm1 = vcmask 588800   ;;  %s856_s28 = smov 119   ;;  %s859_s17 = smov 127   ;;  %v864_v37 = vmov 0.0|0.0   ;;  %s1065_s0 = inlined_call_operand.vmem [shape: f32[72,128], index: 0, kind: input, shape index: {}]   ;;  %s1066_s5 = inlined_call_operand.vmem [shape: f32[16,8], index: 5, kind: input, shape index: {}]   ;;  %s1067_s1 = inlined_call_operand.vmem [shape: f32[16,72], index: 1, kind: input, shape index: {}]   ;;  %s1068_s2 = inlined_call_operand.vmem [shape: f32[16,1], index: 2, kind: input, shape index: {}]   ;;  %s1069_s7 = inlined_call_operand.vmem [shape: f32[9,128], index: 7, kind: input, shape index: {}]   ;;  %s1070_s3 = inlined_call_operand.vmem [shape: f32[16,144], index: 3, kind: input, shape index: {}]   ;;  %s1071_s6 = inlined_call_operand.vmem [shape: f32[16,1], index: 6, kind: input, shape index: {}]   ;;  %s1072_s4 = inlined_call_operand.vmem [shape: f32[16,1], index: 4, kind: input, shape index: {}]   ;;  %s1073_s8 = inlined_call_operand.vmem [shape: f32[16,128], index: 8, kind: output, shape index: {}]  }
   0x1   :  { %v38_v0 = vld [vmem:[%s1065_s0 + $0x20] sm:$0xff]  ;;  %v40_v2 = vld [vmem:[%s1066_s5 + $0x8] sm:$0xff]  ;;  %773 = vset.pattern.permute.xlu0 %v855_v3  ;;  %854 = vset.pattern.permute.xlu1 %v855_v3  ;;  %v31_v6 = vld [vmem:[%s1065_s0 + $0x10] sm:$0xff]  ;;  %s860_s24 = smov 1   ;;  %s861_s25 = smov 7   ;;  %vm573_vm2 = vcmask 130048  }
   0x2   :  { %v39_v1 = vld [vmem:[%s1066_s5] sm:$0xff]  ;;  %694 = vmatprep.subr.mxu1 %v38_v0  ;;  %v30_v5 = vld [vmem:[%s1065_s0 + $0x8] sm:$0xff]  ;;  %v32_v8 = vld [vmem:[%s1065_s0 + $0x18] sm:$0xff]  ;;  %s858_s5 = smov 121   ;;  %s862_s10 = smov 8   ;;  %736 = vmatprep.subr.bf16.mxu0 %v864_v37  ;;  %vm270_vm3 = vcmask 72704  }
   0x3   :  { %696 = vmatprep.mubr.msk.f32.mxu1 %vm53_vm0, %v39_v1  ;;  %v29_v4 = vld [vmem:[%s1065_s0] sm:$0xff]  ;;  %695 = vmatpush3.msra.mxu1 %v38_v0  ;;  %v724_v9 = vpack.c.bf16 %v32_v8, %v31_v6  ;;  %v34_v10 = vld [vmem:[%s1065_s0 + $0x28] sm:$0xff]  ;;  %v35_v16 = vld [vmem:[%s1065_s0 + $0x30] sm:$0xff]  ;;  %s863_s11 = smov 9   ;;  %vm341_vm4 = vcmask 56320   ;;  %vm377_vm5 = vcmask 7168  }
   0x4   :  { %v720_v7 = vpack.c.bf16 %v30_v5, %v29_v4  ;;  %697 = vmatmul.mubr.msk.f32.vlgmr.msra.gmra.mrb[0].mxu1 %vm53_vm0, %v40_v2  ;;  %v135_v11 = vld [vmem:[%s1067_s1] sm:$0xff]  ;;  %v728_v14 = vpack.c.bf16 %v34_v10, %v38_v0  ;;  %v138_v15 = vld [vmem:[%s1068_s2 + $0x8] sm:$0xff]  ;;  %v36_v17 = vld [vmem:[%s1065_s0 + $0x38] sm:$0xff]  ;;  %vm424_vm6 = vcmask 1039360   ;;  %vm460_vm7 = vcmask 990208  }
   0x5   :  { %717 = vmatprep.mubr.msk.f32.mxu1 %vm149_vm1, %v135_v11  ;;  %v137_v12 = vld [vmem:[%s1068_s2] sm:$0xff]  ;;  %v732_v19 = vpack.c.bf16 %v36_v17, %v35_v16  ;;  %s857_s2 = smov 120   ;;  %v136_v26 = vld [vmem:[%s1067_s1 + $0x8] sm:$0xff]  ;;  %vm496_vm8 = vcmask 982016   ;;  %vm532_vm9 = vcmask 973824  }
   0x6   :  { %721 = vmatprep.subr.bf16.mxu1 %v720_v7  ;;  %141 = vperm.xlu0 %773, %v137_v12   ;;  %v669_v13 = vld [vmem:[%s1069_s7] ss:$0 sm:$0xff]  ;;  %v670_v18 = vld [vmem:[%s1069_s7 + $0x1] ss:$0 sm:$0xff]  ;;  %v671_v20 = vld [vmem:[%s1069_s7 + $0x2] ss:$0 sm:$0xff] }
   0x7   :  { %723 = vmatpush3.bf16.msra.mxu1 %v720_v7  ;;  %251 = vrot.lane.b32.xlu1 %v669_v13, %s856_s28  ;;  %v672_v21 = vld [vmem:[%s1069_s7 + $0x3] ss:$0 sm:$0xff]  ;;  %v674_v22 = vld [vmem:[%s1069_s7 + $0x5] ss:$0 sm:$0xff]  ;;  %v675_v24 = vld [vmem:[%s1069_s7 + $0x6] ss:$0 sm:$0xff] }
   0x8   :  { %725 = vmatprep.subr.bf16.mxu1 %v724_v9  ;;  %v37_v23 = vld [vmem:[%s1065_s0 + $0x40] sm:$0xff]  ;;  %v677_v27 = vld [vmem:[%s1069_s7 + $0x8] ss:$0 sm:$0xff] }
   0x9   :  { %v676_v25 = vld [vmem:[%s1069_s7 + $0x7] ss:$0 sm:$0xff]  ;;  %v673_v50 = vld [vmem:[%s1069_s7 + $0x4] ss:$0 sm:$0xff] }
   0xa   :  { %146 = vperm.xlu0 %773, %v138_v15  }
   0xb   :  { %727 = vmatpush3.bf16.msra.mxu1 %v724_v9  ;;  %287 = vrot.lane.b32.xlu1 %v670_v18, %s857_s2 }
   0xc   :  { %729 = vmatprep.subr.bf16.mxu1 %v728_v14 }
   0xe   :  { %322 = vrot.lane.b32.xlu0 %v671_v20, %s858_s5 }
   0xf   :  { %731 = vmatpush3.bf16.msra.mxu1 %v728_v14  ;;  %358 = vrot.lane.b32.xlu1 %v672_v21, %s859_s17 }
  0x10   :  { %733 = vmatprep.subr.bf16.mxu1 %v732_v19 }
  0x12   :  { %405 = vrot.lane.b32.xlu0 %v674_v22, %s860_s24 }
  0x13   :  { %735 = vmatpush3.bf16.msra.mxu1 %v732_v19  ;;  %441 = vrot.lane.b32.xlu1 %v675_v24, %s861_s25 }
  0x14   :  { %715 = vmatprep.subr.mxu1 %v37_v23 }
  0x16   :  { %477 = vrot.lane.b32.xlu0 %v676_v25, %s862_s10 }
  0x17   :  { %716 = vmatpush3.msra.mxu1 %v37_v23  ;;  %513 = vrot.lane.b32.xlu1 %v677_v27, %s863_s11 }
  0x18   :  { %718 = vmatmul.mubr.msk.f32.vlgmr.msra.gmra.mrb[2].mxu1 %vm149_vm1, %v136_v26  ;;  %v540_v26 = vld [vmem:[%s1070_s3 + $0x8] sm:$0xff] }
  0x19   :  { %678 = vmatprep.mubr.msk.f32.mxu0 %vm573_vm2, %v540_v26 }
  0x79   :  { %v252_v31 = vpop.permute.xlu1 %251 }
  0x7a   :  { %v254_v38 = vmul.f32 0.0, %v252_v31 }
  0x7d   :  { %v288_v42 = vpop.permute.xlu1 %287 }
  0x7e   :  { %v290_v44 = vmul.f32 0.0, %v288_v42 }
  0x81   :  { %v359_v58 = vpop.permute.xlu1 %358 }
  0x82   :  { %v361_v59 = vmul.f32 0.0, %v359_v58 }
  0x85   :  { %v142_v30 = vpop.permute.xlu0 %141  ;;  %v442_v7 = vpop.permute.xlu1 %441 }
  0x86   :  { %v445_v8 = vmul.f32 0.0, %v442_v7 }
  0x89   :  { %v147_v32 = vpop.permute.xlu0 %146  ;;  %v514_v17 = vpop.permute.xlu1 %513 }
  0x8a   :  { %v517_v20 = vmul.f32 0.0, %v514_v17 }
  0x8d   :  { %v323_v49 = vpop.permute.xlu0 %322 }
  0x8e   :  { %v325_v51 = vmul.f32 0.0, %v323_v49 }
  0x91   :  { %v406_v1 = vpop.permute.xlu0 %405 }
  0x92   :  { %v409_v2 = vmul.f32 0.0, %v406_v1 }
  0x95   :  { %v478_v11 = vpop.permute.xlu0 %477 }
  0x96   :  { %v481_v14 = vmul.f32 0.0, %v478_v11 }
  0xd7   :  { %v990_v28 = vpop.f32.mrb[0].mxu1 }
  0xd8   :  { %v992_v29 = vpop.f32.mrb[1].mxu1 }
  0xeb   :  { %v719_v33 = vpop.f32.mrb[2].mxu1 }
  0xec   :  { %v228_v34 = vadd.f32 %v719_v33, %v147_v32  ;;  %v222_v35 = vpop.f32.mrb[3].mxu1  ;;  %v561_v32 = vld [vmem:[%s1072_s4] sm:$0xff]  ;;  %v562_v33 = vld [vmem:[%s1072_s4 + $0x8] sm:$0xff] }
  0xed   :  { %v223_v36 = vadd.f32 %v222_v35, %v142_v30  ;;  %v42_v30 = vld [vmem:[%s1071_s6 + $0x8] sm:$0xff] }
  0xee   :  { %v232_v39 = vmax.f32 %v228_v34, 0.0 }
  0xef   :  { %v231_v40 = vmax.f32 %v223_v36, 0.0 }
  0xf0   :  { %v257_v41 = vmul.f32 %v252_v31, %v232_v39  ;;  %v293_v46 = vmul.f32 %v288_v42, %v232_v39  ;;  %v328_v53 = vmul.f32 %v323_v49, %v232_v39  ;;  %v1001_v57 = vmul.f32 %v673_v50, %v232_v39 }
  0xf1   :  { %v255_v43 = vmul.f32 %v252_v31, %v231_v40  ;;  %v291_v48 = vmul.f32 %v288_v42, %v231_v40  ;;  %v326_v55 = vmul.f32 %v323_v49, %v231_v40  ;;  %v999_v56 = vmul.f32 %v673_v50, %v231_v40  ;;  %v41_v31 = vld [vmem:[%s1071_s6] sm:$0xff] }
  0xf2   :  { %v774_v45 = vpack.i.bf16 %v257_v41, %v254_v38  ;;  %v779_v52 = vpack.i.bf16 %v293_v46, %v290_v44  ;;  %v784_v60 = vpack.i.bf16 %v328_v53, %v325_v51  ;;  %v364_v61 = vmul.f32 %v359_v58, %v232_v39 }
  0xf3   :  { %v789_v47 = vpack.i.bf16 %v255_v43, %v254_v38  ;;  %v794_v54 = vpack.i.bf16 %v291_v48, %v290_v44  ;;  %v749_v62 = vpack.c.bf16 %v1001_v57, %v999_v56  ;;  %v799_v63 = vpack.i.bf16 %v326_v55, %v325_v51 }
  0xf4   :  { %775 = vrot.lane.b32.xlu1 %v774_v45, %s863_s11  ;;  %v362_v0 = vmul.f32 %v359_v58, %v231_v40  ;;  %v809_v3 = vpack.i.bf16 %v364_v61, %v361_v59  ;;  %v410_v4 = vmul.f32 %v406_v1, %v232_v39  ;;  %v408_v6 = vmul.f32 %v406_v1, %v231_v40 }
  0xf5   :  { %790 = vrot.lane.b32.xlu0 %v789_v47, %s863_s11  ;;  %v446_v10 = vmul.f32 %v442_v7, %v232_v39  ;;  %v444_v13 = vmul.f32 %v442_v7, %v231_v40  ;;  %v482_v15 = vmul.f32 %v478_v11, %v232_v39  ;;  %v480_v18 = vmul.f32 %v478_v11, %v231_v40 }
  0xf6   :  { %v804_v5 = vpack.i.bf16 %v362_v0, %v361_v59  ;;  %v814_v9 = vpack.i.bf16 %v409_v2, %v410_v4  ;;  %v829_v12 = vpack.i.bf16 %v409_v2, %v408_v6  ;;  %v518_v21 = vmul.f32 %v514_v17, %v232_v39 }
  0xf7   :  { %v819_v16 = vpack.i.bf16 %v445_v8, %v446_v10  ;;  %v834_v19 = vpack.i.bf16 %v445_v8, %v444_v13  ;;  %v824_v22 = vpack.i.bf16 %v481_v14, %v482_v15  ;;  %v516_v23 = vmul.f32 %v514_v17, %v231_v40 }
  0xf8   :  { %780 = vrot.lane.b32.xlu1 %v779_v52, %s862_s10  ;;  %v839_v24 = vpack.i.bf16 %v481_v14, %v480_v18  ;;  %v849_v25 = vpack.i.bf16 %v517_v20, %v518_v21 }
  0xf9   :  { %795 = vrot.lane.b32.xlu0 %v794_v54, %s862_s10  ;;  %v844_v27 = vpack.i.bf16 %v517_v20, %v516_v23 }
  0xfc   :  { %785 = vrot.lane.b32.xlu1 %v784_v60, %s861_s25 }
  0xfd   :  { %800 = vrot.lane.b32.xlu0 %v799_v63, %s861_s25 }
 0x100   :  { %810 = vrot.lane.b32.xlu1 %v809_v3, %s860_s24 }
 0x101   :  { %805 = vrot.lane.b32.xlu0 %v804_v5, %s860_s24 }
 0x104   :  { %815 = vrot.lane.b32.xlu1 %v814_v9, %s859_s17 }
 0x105   :  { %830 = vrot.lane.b32.xlu0 %v829_v12, %s859_s17 }
 0x108   :  { %820 = vrot.lane.b32.xlu1 %v819_v16, %s858_s5 }
 0x109   :  { %835 = vrot.lane.b32.xlu0 %v834_v19, %s858_s5 }
 0x10c   :  { %825 = vrot.lane.b32.xlu1 %v824_v22, %s857_s2 }
 0x10d   :  { %840 = vrot.lane.b32.xlu0 %v839_v24, %s857_s2 }
 0x110   :  { %850 = vrot.lane.b32.xlu1 %v849_v25, %s856_s28 }
 0x111   :  { %845 = vrot.lane.b32.xlu0 %v844_v27, %s856_s28 }
 0x114   :  { %50 = vperm.xlu1 %854, %v42_v30  }
 0x115   :  { %45 = vperm.xlu0 %773, %v41_v31  }
 0x118   :  { %570 = vperm.xlu1 %854, %v562_v33  }
 0x119   :  { %565 = vperm.xlu0 %773, %v561_v32  }
 0x166   :  { %v776_v34 = vpop.permute.xlu1 %775 }
 0x167   :  { %v778_v35 = vunpack.i.h.bf16 %v776_v34  ;;  %v777_v36 = vunpack.i.l.bf16 %v776_v34  ;;  %v791_v38 = vpop.permute.xlu0 %790 }
 0x168   :  { %v793_v39 = vunpack.i.h.bf16 %v791_v38  ;;  %v792_v40 = vunpack.i.l.bf16 %v791_v38 }
 0x169   :  { %v272_v41 = vsel %vm270_vm3, %v777_v36, %v778_v35 }
 0x16a   :  { %v781_v42 = vpop.permute.xlu1 %780  ;;  %v271_v43 = vsel %vm270_vm3, %v792_v40, %v793_v39 }
 0x16b   :  { %v783_v44 = vunpack.i.h.bf16 %v781_v42  ;;  %v782_v45 = vunpack.i.l.bf16 %v781_v42  ;;  %v796_v46 = vpop.permute.xlu0 %795  ;;  %v737_v47 = vpack.c.bf16 %v272_v41, %v271_v43 }
 0x16c   :  { %v798_v48 = vunpack.i.h.bf16 %v796_v46  ;;  %v797_v49 = vunpack.i.l.bf16 %v796_v46  ;;  %v539_v46 = vld [vmem:[%s1070_s3] sm:$0xff] }
 0x16d   :  { %738 = vmatpush1.bf16.msra.mxu0 %v737_v47  ;;  %v307_v50 = vsel %vm53_vm0, %v782_v45, %v783_v44  ;;  %v542_v47 = vld [vmem:[%s1070_s3 + $0x18] sm:$0xff] }
 0x16e   :  { %v786_v51 = vpop.permute.xlu1 %785  ;;  %739 = vmatprep.subr.bf16.mxu0 %v864_v37  ;;  %v306_v52 = vsel %vm53_vm0, %v797_v49, %v798_v48  ;;  %v541_v48 = vld [vmem:[%s1070_s3 + $0x10] sm:$0xff] }
 0x16f   :  { %v788_v53 = vunpack.i.h.bf16 %v786_v51  ;;  %v787_v54 = vunpack.i.l.bf16 %v786_v51  ;;  %v801_v55 = vpop.permute.xlu0 %800  ;;  %v740_v58 = vpack.c.bf16 %v307_v50, %v306_v52 }
 0x170   :  { %v803_v59 = vunpack.i.h.bf16 %v801_v55  ;;  %v802_v60 = vunpack.i.l.bf16 %v801_v55 }
 0x171   :  { %741 = vmatpush1.bf16.msra.mxu0 %v740_v58  ;;  %v343_v61 = vsel %vm341_vm4, %v787_v54, %v788_v53 }
 0x172   :  { %v811_v63 = vpop.permute.xlu1 %810  ;;  %742 = vmatprep.subr.bf16.mxu0 %v864_v37  ;;  %v342_v0 = vsel %vm341_vm4, %v802_v60, %v803_v59 }
 0x173   :  { %v813_v1 = vunpack.i.h.bf16 %v811_v63  ;;  %v812_v2 = vunpack.i.l.bf16 %v811_v63  ;;  %v806_v3 = vpop.permute.xlu0 %805  ;;  %v743_v4 = vpack.c.bf16 %v343_v61, %v342_v0 }
 0x174   :  { %v808_v5 = vunpack.i.h.bf16 %v806_v3  ;;  %v807_v6 = vunpack.i.l.bf16 %v806_v3 }
 0x175   :  { %744 = vmatpush1.bf16.msra.mxu0 %v743_v4  ;;  %v379_v7 = vsel %vm377_vm5, %v812_v2, %v813_v1 }
 0x176   :  { %v816_v8 = vpop.permute.xlu1 %815  ;;  %745 = vmatprep.subr.bf16.mxu0 %v864_v37  ;;  %v378_v9 = vsel %vm377_vm5, %v807_v6, %v808_v5 }
 0x177   :  { %v818_v10 = vunpack.i.h.bf16 %v816_v8  ;;  %v817_v11 = vunpack.i.l.bf16 %v816_v8  ;;  %v831_v12 = vpop.permute.xlu0 %830  ;;  %v746_v13 = vpack.c.bf16 %v379_v7, %v378_v9 }
 0x178   :  { %v833_v14 = vunpack.i.h.bf16 %v831_v12  ;;  %v832_v15 = vunpack.i.l.bf16 %v831_v12 }
 0x179   :  { %747 = vmatpush1.bf16.msra.mxu0 %v746_v13  ;;  %v426_v19 = vsel %vm424_vm6, %v817_v11, %v818_v10 }
 0x17a   :  { %v821_v16 = vpop.permute.xlu1 %820  ;;  %748 = vmatprep.subr.bf16.mxu0 %v864_v37  ;;  %v425_v18 = vsel %vm424_vm6, %v832_v15, %v833_v14 }
 0x17b   :  { %v836_v17 = vpop.permute.xlu0 %835  ;;  %v823_v20 = vunpack.i.h.bf16 %v821_v16  ;;  %v822_v21 = vunpack.i.l.bf16 %v821_v16  ;;  %v752_v30 = vpack.c.bf16 %v426_v19, %v425_v18 }
 0x17c   :  { %v838_v22 = vunpack.i.h.bf16 %v836_v17  ;;  %v837_v23 = vunpack.i.l.bf16 %v836_v17 }
 0x17d   :  { %750 = vmatpush1.bf16.msra.mxu0 %v749_v62  ;;  %v462_v34 = vsel %vm460_vm7, %v822_v21, %v823_v20 }
 0x17e   :  { %v826_v24 = vpop.permute.xlu1 %825  ;;  %751 = vmatprep.subr.bf16.mxu0 %v864_v37  ;;  %v461_v33 = vsel %vm460_vm7, %v837_v23, %v838_v22 }
 0x17f   :  { %v828_v25 = vunpack.i.h.bf16 %v826_v24  ;;  %v827_v26 = vunpack.i.l.bf16 %v826_v24  ;;  %v841_v27 = vpop.permute.xlu0 %840  ;;  %v755_v56 = vpack.c.bf16 %v462_v34, %v461_v33 }
 0x180   :  { %v843_v31 = vunpack.i.h.bf16 %v841_v27  ;;  %v842_v32 = vunpack.i.l.bf16 %v841_v27 }
 0x181   :  { %753 = vmatpush1.bf16.msra.mxu0 %v752_v30  ;;  %v498_v62 = vsel %vm496_vm8, %v827_v26, %v828_v25 }
 0x182   :  { %v851_v35 = vpop.permute.xlu1 %850  ;;  %754 = vmatprep.subr.bf16.mxu0 %v864_v37  ;;  %v497_v57 = vsel %vm496_vm8, %v842_v32, %v843_v31 }
 0x183   :  { %v846_v36 = vpop.permute.xlu0 %845  ;;  %v853_v38 = vunpack.i.h.bf16 %v851_v35  ;;  %v852_v39 = vunpack.i.l.bf16 %v851_v35  ;;  %v758_v42 = vpack.c.bf16 %v498_v62, %v497_v57 }
 0x184   :  { %v848_v40 = vunpack.i.h.bf16 %v846_v36  ;;  %v847_v41 = vunpack.i.l.bf16 %v846_v36 }
 0x185   :  { %756 = vmatpush1.bf16.msra.mxu0 %v755_v56  ;;  %v534_v44 = vsel %vm532_vm9, %v852_v39, %v853_v38 }
 0x186   :  { %757 = vmatprep.subr.bf16.mxu0 %v864_v37  ;;  %v533_v43 = vsel %vm532_vm9, %v847_v41, %v848_v40 }
 0x187   :  { %v761_v45 = vpack.c.bf16 %v534_v44, %v533_v43 }
 0x189   :  { %759 = vmatpush1.bf16.msra.mxu0 %v758_v42 }
 0x18a   :  { %760 = vmatprep.subr.bf16.mxu0 %v864_v37 }
 0x18d   :  { %762 = vmatpush1.bf16.msra.mxu0 %v761_v45 }
 0x190   :  { %645 = vmatmul.mubr.f32.vlgmr.msra.gmra.mrb[0].mxu0 %v539_v46 }
 0x191   :  { %679 = vmatprep.mubr.msk.f32.mxu0 %vm573_vm2, %v542_v47 }
 0x193   :  { %v51_v37 = vpop.permute.xlu1 %50 }
 0x194   :  { %650 = vmatmul.mubr.f32.gmra.mrb[2].mxu0 %v541_v48  ;;  %v46_v49 = vpop.permute.xlu0 %45  ;;  %v132_v60 = vadd.f32 %v990_v28, %v51_v37 }
 0x195   :  { %v127_v52 = vadd.f32 %v992_v29, %v46_v49 }
 0x197   :  { %v571_v58 = vpop.permute.xlu1 %570 }
 0x198   :  { %v566_v50 = vpop.permute.xlu0 %565 }
 0x263   :  { %v646_v51 = vpop.f32.mrb[0].mxu0 }
 0x264   :  { %v647_v53 = vadd.f32 %v646_v51, %v566_v50  ;;  %v648_v54 = vpop.f32.mrb[1].mxu0 }
 0x266   :  { %v655_v55 = vadd.f32 %v647_v53, %v127_v52 }
 0x267   :  { %v651_v59 = vpop.f32.mrb[2].mxu0 }
 0x268   :  { %v657_v61 = vmax.f32 %v655_v55, 0.0  ;;  %v652_v63 = vadd.f32 %v651_v59, %v571_v58  ;;  %v653_v0 = vpop.f32.mrb[3].mxu0 }
 0x26a   :  { %659 = vst [vmem:[%s1073_s8] sm:$0xff] %v657_v61  ;;  %v656_v1 = vadd.f32 %v652_v63, %v132_v60 }
 0x26c   :  { %v658_v2 = vmax.f32 %v656_v1, 0.0 }
 0x26e   :  { %660 = vst [vmem:[%s1073_s8 + $0x8] sm:$0xff] %v658_v2 }

</bundles_post_ra>
